<compile_context>
chip_gen: v7x
topology: tpu7x:2x2x1
jax: 0.10.0
libtpu: 0.0.40
codegen_flags: <defaults>
</compile_context>

<pallas_src>
import functools

import jax
import jax.numpy as jnp
from jax import lax
from jax.experimental import pallas as pl
from jax.experimental.pallas import tpu as pltpu


def _round_up(x, m):
    return (x + m - 1) // m * m


def _lstm_kernel(x_ref, w_ih_ref, b_ref, w_hh_ref, w_fc_ref, b_fc_ref, out_ref,
                 h_ref, c_ref, gx_ref, *, seq_len, mask_tail):
    """One time-chunk of the LSTM recurrence (fused input projection + final FC).

    x_ref:    (tc, Bp, I)    fp32  time-major input chunk (streamed via BlockSpec)
    w_ih_ref: (I, 4*Hp)      fp32  input->gates weight (pre-transposed, gate-padded, resident)
    b_ref:    (1, 4*Hp)      fp32  b_ih + b_hh (gate-padded, resident)
    w_hh_ref: (Hp, 4*Hp)     fp32  hidden->gates weight (pre-transposed, resident)
    w_fc_ref: (Hp, Op)       fp32  fc weight (pre-transposed, padded, resident)
    b_fc_ref: (1, Op)        fp32  fc bias (padded)
    out_ref:  (Bp, Op)       fp32  final output (fully written on the last chunk only)
    h_ref, c_ref: (Bp, Hp)   fp32  persistent recurrent state (VMEM scratch)
    gx_ref:   (tc, Bp, 4*Hp) fp32  this chunk's gate pre-activations (VMEM scratch)
    """
    chunk = pl.program_id(0)
    tc, Bp, I = x_ref.shape
    Hp = h_ref.shape[1]

    @pl.when(chunk == 0)
    def _init():
        h_ref[...] = jnp.zeros_like(h_ref)
        c_ref[...] = jnp.zeros_like(c_ref)

    # Fused input projection for the whole chunk: one tall (tc*Bp, I) x (I, 4Hp) matmul with
    # the bias folded in.  The gate tensor lives only in this VMEM scratch, never in HBM.
    gx_ref[...] = (
        jnp.dot(x_ref[...].reshape(tc * Bp, I), w_ih_ref[...],
                preferred_element_type=jnp.float32)
        + b_ref[...]
    ).reshape(tc, Bp, 4 * Hp)

    w_hh = w_hh_ref[...]          # resident recurrent weights, loaded once per chunk
    t0 = chunk * tc

    def step(t, carry):
        h, c = carry
        gates = gx_ref[t] + jnp.dot(h, w_hh, preferred_element_type=jnp.float32)  # (Bp, 4Hp)
        # Each gate occupies whole 128-lane vregs (Hp % 128 == 0).
        # sigmoid(x) == 0.5*tanh(0.5*x) + 0.5: single EUP push per gate.
        i_g = 0.5 * jnp.tanh(0.5 * gates[:, 0 * Hp:1 * Hp]) + 0.5
        f_g = 0.5 * jnp.tanh(0.5 * gates[:, 1 * Hp:2 * Hp]) + 0.5
        g_g = jnp.tanh(gates[:, 2 * Hp:3 * Hp])
        o_g = 0.5 * jnp.tanh(0.5 * gates[:, 3 * Hp:4 * Hp]) + 0.5
        c_new = f_g * c + i_g * g_g
        h_new = o_g * jnp.tanh(c_new)
        if mask_tail:
            # Grid is padded past T; padded tail steps leave the state untouched.
            keep = ((t0 + t) < seq_len).astype(jnp.float32)
            c_new = keep * c_new + (1.0 - keep) * c
            h_new = keep * h_new + (1.0 - keep) * h
        return h_new, c_new

    h, c = lax.fori_loop(0, tc, step, (h_ref[...], c_ref[...]), unroll=True)
    h_ref[...] = h
    c_ref[...] = c

    @pl.when(chunk == pl.num_programs(0) - 1)
    def _finalize():
        out_ref[...] = (
            jnp.dot(h, w_fc_ref[...], preferred_element_type=jnp.float32) + b_fc_ref[...]
        ).astype(out_ref.dtype)


def _pad_gate_cols(w_t, H, Hp):
    """(rows, 4H) -> (rows, 4Hp): each PyTorch gate block [i, f, g, o] moved to a 128-aligned slot."""
    rows = w_t.shape[0]
    out = jnp.zeros((rows, 4 * Hp), w_t.dtype)
    for k in range(4):
        out = out.at[:, k * Hp:k * Hp + H].set(w_t[:, k * H:(k + 1) * H])
    return out


def lstm_module_forward(x, params, *, t_chunk=32):
    """x: (B, T, I) fp32, batch_first like PyTorch.  Returns fc(h_T): (B, O) fp32."""
    B, T, I = x.shape
    H = params["w_hh"].shape[1]
    O = params["w_fc"].shape[0]

    Hp = _round_up(H, 128)        # lane-aligned gates
    Op = _round_up(O, 128)        # lane-dense output store
    Bp = _round_up(max(B, 8), 8)  # sublane-aligned batch

    # ---- gate-aligned, zero-padded fp32 weights.  Zero padding keeps the padded hidden lanes
    #      at exactly 0 through the recurrence; zero rows of W_fc mask them in the FC. ----
    w_ih_p = _pad_gate_cols(params["w_ih"].T, H, Hp)                                   # (I, 4Hp)
    w_hh_p = (jnp.zeros((Hp, 4 * Hp), jnp.float32)
              .at[:H].set(_pad_gate_cols(params["w_hh"].T, H, Hp)))                    # (Hp, 4Hp)
    b_p = _pad_gate_cols((params["b_ih"] + params["b_hh"]).reshape(1, 4 * H), H, Hp)   # (1, 4Hp)
    w_fc_p = jnp.zeros((Hp, Op), jnp.float32).at[:H, :O].set(params["w_fc"].T)         # (Hp, Op)
    b_fc_p = jnp.zeros((1, Op), jnp.float32).at[:, :O].set(params["b_fc"].reshape(1, O))

    # ---- time chunking: pad the grid (mask tail timesteps) instead of shrinking the chunk ----
    tc = max(1, min(t_chunk, T))
    # Resident weights + states + double-buffered x chunk + gx scratch must fit a budget that
    # is safe on v7x (64 MiB physical VMEM); v5e/v6e (128 MiB) have plenty of slack.
    vmem_budget = 40 * 1024 * 1024
    fixed_bytes = 4 * (w_ih_p.size + w_hh_p.size + b_p.size + w_fc_p.size + b_fc_p.size
                       + 2 * Bp * Hp + Bp * Op)
    chunk_bytes = lambda t: 4 * (2 * t * Bp * I + t * Bp * 4 * Hp)
    while tc > 1 and fixed_bytes + chunk_bytes(tc) > vmem_budget:
        tc = (tc + 1) // 2
    n_chunks = pl.cdiv(T, tc)
    Tp = n_chunks * tc
    mask_tail = Tp != T

    # Time-major padded input: the only per-timestep tensor streamed from HBM (just I feature
    # lanes wide); its transpose/pad is cheap relative to the old (T, Bp, 4Hp) gate tensor.
    x_tm = (jnp.zeros((Tp, Bp, I), jnp.float32)
            .at[:T, :B].set(jnp.swapaxes(x, 0, 1).astype(jnp.float32)))

    flops = (2 * Tp * Bp * I * 4 * Hp        # fused input projection
             + 2 * Tp * Bp * Hp * 4 * Hp     # recurrent matmul
             + 2 * Bp * Hp * Op)             # final FC
    transcendentals = 5 * Tp * Bp * Hp       # 5 tanh per element per step
    bytes_accessed = (x_tm.size + w_ih_p.size + w_hh_p.size + b_p.size
                      + w_fc_p.size + b_fc_p.size + Bp * Op) * 4

    kernel = functools.partial(_lstm_kernel, seq_len=T, mask_tail=mask_tail)

    out_p = pl.pallas_call(
        kernel,
        out_shape=jax.ShapeDtypeStruct((Bp, Op), jnp.float32),
        grid_spec=pltpu.PrefetchScalarGridSpec(
            num_scalar_prefetch=0,
            grid=(n_chunks,),
            in_specs=[
                pl.BlockSpec((tc, Bp, I), lambda c: (c, 0, 0)),     # streamed x chunk
                pl.BlockSpec((I, 4 * Hp), lambda c: (0, 0)),        # W_ih (resident)
                pl.BlockSpec((1, 4 * Hp), lambda c: (0, 0)),        # gate bias (resident)
                pl.BlockSpec((Hp, 4 * Hp), lambda c: (0, 0)),       # W_hh (resident)
                pl.BlockSpec((Hp, Op), lambda c: (0, 0)),           # W_fc (resident)
                pl.BlockSpec((1, Op), lambda c: (0, 0)),            # b_fc (resident)
            ],
            out_specs=pl.BlockSpec((Bp, Op), lambda c: (0, 0)),
            scratch_shapes=[
                pltpu.VMEM((Bp, Hp), jnp.float32),                  # h state (persists across chunks)
                pltpu.VMEM((Bp, Hp), jnp.float32),                  # c state
                pltpu.VMEM((tc, Bp, 4 * Hp), jnp.float32),          # per-chunk gate pre-activations
            ],
        ),
        compiler_params=pltpu.CompilerParams(
            dimension_semantics=("arbitrary",),     # the time recurrence is inherently serial
            vmem_limit_bytes=48 * 1024 * 1024,      # <= v7x 64 MiB physical; ample on v5e/v6e
        ),
        cost_estimate=pl.CostEstimate(flops=int(flops),
                                      transcendentals=int(transcendentals),
                                      bytes_accessed=int(bytes_accessed)),
    )(x_tm, w_ih_p, b_p, w_hh_p, w_fc_p, b_fc_p)

    return out_p[:B, :O]


def init_params(key, input_size, hidden_size, output_size):
    """PyTorch-layout parameters: uniform(-1/sqrt(H), 1/sqrt(H)), gate order [i, f, g, o]."""
    ks = jax.random.split(key, 6)
    k = hidden_size ** -0.5
    return {
        "w_ih": jax.random.uniform(ks[0], (4 * hidden_size, input_size), jnp.float32, -k, k),
        "w_hh": jax.random.uniform(ks[1], (4 * hidden_size, hidden_size), jnp.float32, -k, k),
        "b_ih": jax.random.uniform(ks[2], (4 * hidden_size,), jnp.float32, -k, k),
        "b_hh": jax.random.uniform(ks[3], (4 * hidden_size,), jnp.float32, -k, k),
        "w_fc": jax.random.uniform(ks[4], (output_size, hidden_size), jnp.float32, -k, k),
        "b_fc": jax.random.uniform(ks[5], (output_size,), jnp.float32, -k, k),
    }


def reference_forward(x, params):
    """Pure-JAX fp32 reference matching PyTorch nn.LSTM + nn.Linear semantics exactly."""
    B, T, _ = x.shape
    H = params["w_hh"].shape[1]
    w_ih_t = params["w_ih"].T
    w_hh_t = params["w_hh"].T
    w_fc_t = params["w_fc"].T
    b = (params["b_ih"] + params["b_hh"]).reshape(1, 4 * H)
    h = jnp.zeros((B, H), jnp.float32)
    c = jnp.zeros((B, H), jnp.float32)
    for t in range(T):
        gates = x[:, t, :] @ w_ih_t + h @ w_hh_t + b
        i_g = jax.nn.sigmoid(gates[:, 0 * H:1 * H])
        f_g = jax.nn.sigmoid(gates[:, 1 * H:2 * H])
        g_g = jnp.tanh(gates[:, 2 * H:3 * H])
        o_g = jax.nn.sigmoid(gates[:, 3 * H:4 * H])
        c = f_g * c + i_g * g_g
        h = o_g * jnp.tanh(c)
    return h @ w_fc_t + params["b_fc"].reshape(1, -1)


if __name__ == "__main__":
    B, T, I, H, O = 2, 8, 16, 32, 4

    key = jax.random.PRNGKey(0)
    k_x, k_p = jax.random.split(key)
    x = jax.random.normal(k_x, (B, T, I), jnp.float32)
    params = init_params(k_p, I, H, O)

    ref = reference_forward(x, params)

    # (a) multi-chunk with a masked tail (T=8, tc=3 -> 3 chunks): exercises state carry + masking
    out_a = jax.block_until_ready(lstm_module_forward(x, params, t_chunk=3))
    # (b) evenly divided chunks (T=8, tc=4 -> 2 chunks)
    out_b = jax.block_until_ready(lstm_module_forward(x, params, t_chunk=4))
    # (c) default fat-chunk path (single chunk covering the whole sequence)
    out_c = jax.block_until_ready(lstm_module_forward(x, params))

    for out in (out_a, out_b, out_c):
        assert out.shape == (B, O)
        assert jnp.allclose(out, ref, atol=1e-4, rtol=1e-4), (out, ref)

    print("KERNEL_OK")
</pallas_src>

<mosaic_0001>
module attributes {stable_mosaic.version = 11 : i64} {
  func.func @_lstm_kernel(%arg0: i32, %arg1: memref<3x8x16xf32, #tpu.memory_space<vmem>>, %arg2: memref<16x512xf32, #tpu.memory_space<vmem>>, %arg3: memref<1x512xf32, #tpu.memory_space<vmem>>, %arg4: memref<128x512xf32, #tpu.memory_space<vmem>>, %arg5: memref<128x128xf32, #tpu.memory_space<vmem>>, %arg6: memref<1x128xf32, #tpu.memory_space<vmem>>, %arg7: memref<8x128xf32, #tpu.memory_space<vmem>>, %arg8: memref<8x128xf32, #tpu.memory_space<vmem>>, %arg9: memref<8x128xf32, #tpu.memory_space<vmem>>, %arg10: memref<3x8x512xf32, #tpu.memory_space<vmem>>) attributes {dimension_semantics = [#tpu.dimension_semantics<arbitrary>], iteration_bounds = array<i64: 3>, scalar_prefetch = 0 : i64, scratch_operands = 3 : i64, tpu.core_type = #tpu.core_type<tc>, window_params = [{transform_indices = @transform_0, window_bounds = array<i64: 3, 8, 16>}, {pipeline_mode = #tpu.pipeline_mode<synchronous>, transform_indices = @transform_1, window_bounds = array<i64: 16, 512>}, {pipeline_mode = #tpu.pipeline_mode<synchronous>, transform_indices = @transform_2, window_bounds = array<i64: 1, 512>}, {pipeline_mode = #tpu.pipeline_mode<synchronous>, transform_indices = @transform_3, window_bounds = array<i64: 128, 512>}, {pipeline_mode = #tpu.pipeline_mode<synchronous>, transform_indices = @transform_4, window_bounds = array<i64: 128, 128>}, {pipeline_mode = #tpu.pipeline_mode<synchronous>, transform_indices = @transform_5, window_bounds = array<i64: 1, 128>}, {pipeline_mode = #tpu.pipeline_mode<synchronous>, transform_indices = @transform_6, window_bounds = array<i64: 8, 128>}]} {
    %c0_i32 = arith.constant 0 : i32
    %0 = arith.cmpi eq, %arg0, %c0_i32 : i32
    %1 = arith.extui %0 : i1 to i32
    %c0_i32_0 = arith.constant 0 : i32
    %2 = arith.cmpi ne, %1, %c0_i32_0 : i32
    scf.if %2 {
      %cst_68 = arith.constant 0.000000e+00 : f32
      %177 = vector.broadcast %cst_68 : f32 to vector<8x128xf32>
      %c0_69 = arith.constant 0 : index
      %c0_70 = arith.constant 0 : index
      %178 = vector.load %arg8[%c0_69, %c0_70] : memref<8x128xf32, #tpu.memory_space<vmem>>, vector<8x128xf32>
      tpu.vector_store %arg8[%c0_69, %c0_70], %177 {strides = array<i32>} : memref<8x128xf32, #tpu.memory_space<vmem>>, vector<8x128xf32>,
      %cst_71 = arith.constant 0.000000e+00 : f32
      %179 = vector.broadcast %cst_71 : f32 to vector<8x128xf32>
      %c0_72 = arith.constant 0 : index
      %c0_73 = arith.constant 0 : index
      %180 = vector.load %arg9[%c0_72, %c0_73] : memref<8x128xf32, #tpu.memory_space<vmem>>, vector<8x128xf32>
      tpu.vector_store %arg9[%c0_72, %c0_73], %179 {strides = array<i32>} : memref<8x128xf32, #tpu.memory_space<vmem>>, vector<8x128xf32>,
    } else {
    }
    %c0 = arith.constant 0 : index
    %c0_1 = arith.constant 0 : index
    %c0_2 = arith.constant 0 : index
    %3 = vector.load %arg1[%c0, %c0_1, %c0_2] : memref<3x8x16xf32, #tpu.memory_space<vmem>>, vector<3x8x16xf32>
    %4 = vector.shape_cast %3 : vector<3x8x16xf32> to vector<24x16xf32>
    %c0_3 = arith.constant 0 : index
    %c0_4 = arith.constant 0 : index
    %5 = vector.load %arg2[%c0_3, %c0_4] : memref<16x512xf32, #tpu.memory_space<vmem>>, vector<16x512xf32>
    %cst = arith.constant dense<0.000000e+00> : vector<24x512xf32>
    %6 = tpu.matmul %4, %5, %cst {dimension_numbers = #tpu.dot_dimension_numbers<[1], [0], [0], [1], [0, 0, 1, 1], [], []>} : vector<24x16xf32>, vector<16x512xf32>, vector<24x512xf32> -> vector<24x512xf32>
    %c0_5 = arith.constant 0 : index
    %c0_6 = arith.constant 0 : index
    %7 = vector.load %arg3[%c0_5, %c0_6] : memref<1x512xf32, #tpu.memory_space<vmem>>, vector<1x512xf32>
    %8 = vector.broadcast %7 : vector<1x512xf32> to vector<24x512xf32>
    %9 = arith.addf %6, %8 : vector<24x512xf32>
    %10 = vector.shape_cast %9 : vector<24x512xf32> to vector<3x8x512xf32>
    %c0_7 = arith.constant 0 : index
    %c0_8 = arith.constant 0 : index
    %c0_9 = arith.constant 0 : index
    %11 = vector.load %arg10[%c0_7, %c0_8, %c0_9] : memref<3x8x512xf32, #tpu.memory_space<vmem>>, vector<3x8x512xf32>
    tpu.vector_store %arg10[%c0_7, %c0_8, %c0_9], %10 {strides = array<i32>} : memref<3x8x512xf32, #tpu.memory_space<vmem>>, vector<3x8x512xf32>,
    %c0_10 = arith.constant 0 : index
    %c0_11 = arith.constant 0 : index
    %12 = vector.load %arg4[%c0_10, %c0_11] : memref<128x512xf32, #tpu.memory_space<vmem>>, vector<128x512xf32>
    %c3_i32 = arith.constant 3 : i32
    %13 = arith.muli %arg0, %c3_i32 : i32
    %c0_12 = arith.constant 0 : index
    %c0_13 = arith.constant 0 : index
    %14 = vector.load %arg8[%c0_12, %c0_13] : memref<8x128xf32, #tpu.memory_space<vmem>>, vector<8x128xf32>
    %c0_14 = arith.constant 0 : index
    %c0_15 = arith.constant 0 : index
    %15 = vector.load %arg9[%c0_14, %c0_15] : memref<8x128xf32, #tpu.memory_space<vmem>>, vector<8x128xf32>
    %c0_i32_16 = arith.constant 0 : i32
    %16 = arith.index_cast %c0_i32_16 : i32 to index
    %c0_17 = arith.constant 0 : index
    %c0_18 = arith.constant 0 : index
    %17 = vector.load %arg10[%16, %c0_17, %c0_18] : memref<3x8x512xf32, #tpu.memory_space<vmem>>, vector<1x8x512xf32>
    %18 = vector.shape_cast %17 : vector<1x8x512xf32> to vector<8x512xf32>
    %cst_19 = arith.constant dense<0.000000e+00> : vector<8x512xf32>
    %19 = tpu.matmul %14, %12, %cst_19 {dimension_numbers = #tpu.dot_dimension_numbers<[1], [0], [0], [1], [0, 0, 1, 1], [], []>} : vector<8x128xf32>, vector<128x512xf32>, vector<8x512xf32> -> vector<8x512xf32>
    %20 = arith.addf %18, %19 : vector<8x512xf32>
    %21 = vector.extract_strided_slice %20 {offsets = [0, 0], sizes = [8, 128], strides = [1, 1]} : vector<8x512xf32> to vector<8x128xf32>
    %cst_20 = arith.constant 5.000000e-01 : f32
    %22 = vector.broadcast %cst_20 : f32 to vector<8x128xf32>
    %23 = arith.mulf %22, %21 : vector<8x128xf32>
    %24 = math.tanh %23 : vector<8x128xf32>
    %cst_21 = arith.constant 5.000000e-01 : f32
    %25 = vector.broadcast %cst_21 : f32 to vector<8x128xf32>
    %26 = arith.mulf %25, %24 : vector<8x128xf32>
    %cst_22 = arith.constant 5.000000e-01 : f32
    %27 = vector.broadcast %cst_22 : f32 to vector<8x128xf32>
    %28 = arith.addf %26, %27 : vector<8x128xf32>
    %29 = vector.extract_strided_slice %20 {offsets = [0, 128], sizes = [8, 128], strides = [1, 1]} : vector<8x512xf32> to vector<8x128xf32>
    %cst_23 = arith.constant 5.000000e-01 : f32
    %30 = vector.broadcast %cst_23 : f32 to vector<8x128xf32>
    %31 = arith.mulf %30, %29 : vector<8x128xf32>
    %32 = math.tanh %31 : vector<8x128xf32>
    %cst_24 = arith.constant 5.000000e-01 : f32
    %33 = vector.broadcast %cst_24 : f32 to vector<8x128xf32>
    %34 = arith.mulf %33, %32 : vector<8x128xf32>
    %cst_25 = arith.constant 5.000000e-01 : f32
    %35 = vector.broadcast %cst_25 : f32 to vector<8x128xf32>
    %36 = arith.addf %34, %35 : vector<8x128xf32>
    %37 = vector.extract_strided_slice %20 {offsets = [0, 256], sizes = [8, 128], strides = [1, 1]} : vector<8x512xf32> to vector<8x128xf32>
    %38 = math.tanh %37 : vector<8x128xf32>
    %39 = vector.extract_strided_slice %20 {offsets = [0, 384], sizes = [8, 128], strides = [1, 1]} : vector<8x512xf32> to vector<8x128xf32>
    %cst_26 = arith.constant 5.000000e-01 : f32
    %40 = vector.broadcast %cst_26 : f32 to vector<8x128xf32>
    %41 = arith.mulf %40, %39 : vector<8x128xf32>
    %42 = math.tanh %41 : vector<8x128xf32>
    %cst_27 = arith.constant 5.000000e-01 : f32
    %43 = vector.broadcast %cst_27 : f32 to vector<8x128xf32>
    %44 = arith.mulf %43, %42 : vector<8x128xf32>
    %cst_28 = arith.constant 5.000000e-01 : f32
    %45 = vector.broadcast %cst_28 : f32 to vector<8x128xf32>
    %46 = arith.addf %44, %45 : vector<8x128xf32>
    %47 = arith.mulf %36, %15 : vector<8x128xf32>
    %48 = arith.mulf %28, %38 : vector<8x128xf32>
    %49 = arith.addf %47, %48 : vector<8x128xf32>
    %50 = math.tanh %49 : vector<8x128xf32>
    %51 = arith.mulf %46, %50 : vector<8x128xf32>
    %52 = arith.addi %13, %c0_i32_16 : i32
    %c8_i32 = arith.constant 8 : i32
    %53 = arith.cmpi slt, %52, %c8_i32 : i32
    %54 = arith.extui %53 : i1 to i32
    %55 = arith.sitofp %54 : i32 to f32
    %56 = vector.broadcast %55 : f32 to vector<8x128xf32>
    %57 = arith.mulf %56, %49 : vector<8x128xf32>
    %cst_29 = arith.constant 1.000000e+00 : f32
    %58 = arith.subf %cst_29, %55 : f32
    %59 = vector.broadcast %58 : f32 to vector<8x128xf32>
    %60 = arith.mulf %59, %15 : vector<8x128xf32>
    %61 = arith.addf %57, %60 : vector<8x128xf32>
    %62 = vector.broadcast %55 : f32 to vector<8x128xf32>
    %63 = arith.mulf %62, %51 : vector<8x128xf32>
    %cst_30 = arith.constant 1.000000e+00 : f32
    %64 = arith.subf %cst_30, %55 : f32
    %65 = vector.broadcast %64 : f32 to vector<8x128xf32>
    %66 = arith.mulf %65, %14 : vector<8x128xf32>
    %67 = arith.addf %63, %66 : vector<8x128xf32>
    %c1_i32 = arith.constant 1 : i32
    %68 = arith.index_cast %c1_i32 : i32 to index
    %c0_31 = arith.constant 0 : index
    %c0_32 = arith.constant 0 : index
    %69 = vector.load %arg10[%68, %c0_31, %c0_32] : memref<3x8x512xf32, #tpu.memory_space<vmem>>, vector<1x8x512xf32>
    %70 = vector.shape_cast %69 : vector<1x8x512xf32> to vector<8x512xf32>
    %cst_33 = arith.constant dense<0.000000e+00> : vector<8x512xf32>
    %71 = tpu.matmul %67, %12, %cst_33 {dimension_numbers = #tpu.dot_dimension_numbers<[1], [0], [0], [1], [0, 0, 1, 1], [], []>} : vector<8x128xf32>, vector<128x512xf32>, vector<8x512xf32> -> vector<8x512xf32>
    %72 = arith.addf %70, %71 : vector<8x512xf32>
    %73 = vector.extract_strided_slice %72 {offsets = [0, 0], sizes = [8, 128], strides = [1, 1]} : vector<8x512xf32> to vector<8x128xf32>
    %cst_34 = arith.constant 5.000000e-01 : f32
    %74 = vector.broadcast %cst_34 : f32 to vector<8x128xf32>
    %75 = arith.mulf %74, %73 : vector<8x128xf32>
    %76 = math.tanh %75 : vector<8x128xf32>
    %cst_35 = arith.constant 5.000000e-01 : f32
    %77 = vector.broadcast %cst_35 : f32 to vector<8x128xf32>
    %78 = arith.mulf %77, %76 : vector<8x128xf32>
    %cst_36 = arith.constant 5.000000e-01 : f32
    %79 = vector.broadcast %cst_36 : f32 to vector<8x128xf32>
    %80 = arith.addf %78, %79 : vector<8x128xf32>
    %81 = vector.extract_strided_slice %72 {offsets = [0, 128], sizes = [8, 128], strides = [1, 1]} : vector<8x512xf32> to vector<8x128xf32>
    %cst_37 = arith.constant 5.000000e-01 : f32
    %82 = vector.broadcast %cst_37 : f32 to vector<8x128xf32>
    %83 = arith.mulf %82, %81 : vector<8x128xf32>
    %84 = math.tanh %83 : vector<8x128xf32>
    %cst_38 = arith.constant 5.000000e-01 : f32
    %85 = vector.broadcast %cst_38 : f32 to vector<8x128xf32>
    %86 = arith.mulf %85, %84 : vector<8x128xf32>
    %cst_39 = arith.constant 5.000000e-01 : f32
    %87 = vector.broadcast %cst_39 : f32 to vector<8x128xf32>
    %88 = arith.addf %86, %87 : vector<8x128xf32>
    %89 = vector.extract_strided_slice %72 {offsets = [0, 256], sizes = [8, 128], strides = [1, 1]} : vector<8x512xf32> to vector<8x128xf32>
    %90 = math.tanh %89 : vector<8x128xf32>
    %91 = vector.extract_strided_slice %72 {offsets = [0, 384], sizes = [8, 128], strides = [1, 1]} : vector<8x512xf32> to vector<8x128xf32>
    %cst_40 = arith.constant 5.000000e-01 : f32
    %92 = vector.broadcast %cst_40 : f32 to vector<8x128xf32>
    %93 = arith.mulf %92, %91 : vector<8x128xf32>
    %94 = math.tanh %93 : vector<8x128xf32>
    %cst_41 = arith.constant 5.000000e-01 : f32
    %95 = vector.broadcast %cst_41 : f32 to vector<8x128xf32>
    %96 = arith.mulf %95, %94 : vector<8x128xf32>
    %cst_42 = arith.constant 5.000000e-01 : f32
    %97 = vector.broadcast %cst_42 : f32 to vector<8x128xf32>
    %98 = arith.addf %96, %97 : vector<8x128xf32>
    %99 = arith.mulf %88, %61 : vector<8x128xf32>
    %100 = arith.mulf %80, %90 : vector<8x128xf32>
    %101 = arith.addf %99, %100 : vector<8x128xf32>
    %102 = math.tanh %101 : vector<8x128xf32>
    %103 = arith.mulf %98, %102 : vector<8x128xf32>
    %104 = arith.addi %13, %c1_i32 : i32
    %c8_i32_43 = arith.constant 8 : i32
    %105 = arith.cmpi slt, %104, %c8_i32_43 : i32
    %106 = arith.extui %105 : i1 to i32
    %107 = arith.sitofp %106 : i32 to f32
    %108 = vector.broadcast %107 : f32 to vector<8x128xf32>
    %109 = arith.mulf %108, %101 : vector<8x128xf32>
    %cst_44 = arith.constant 1.000000e+00 : f32
    %110 = arith.subf %cst_44, %107 : f32
    %111 = vector.broadcast %110 : f32 to vector<8x128xf32>
    %112 = arith.mulf %111, %61 : vector<8x128xf32>
    %113 = arith.addf %109, %112 : vector<8x128xf32>
    %114 = vector.broadcast %107 : f32 to vector<8x128xf32>
    %115 = arith.mulf %114, %103 : vector<8x128xf32>
    %cst_45 = arith.constant 1.000000e+00 : f32
    %116 = arith.subf %cst_45, %107 : f32
    %117 = vector.broadcast %116 : f32 to vector<8x128xf32>
    %118 = arith.mulf %117, %67 : vector<8x128xf32>
    %119 = arith.addf %115, %118 : vector<8x128xf32>
    %c2_i32 = arith.constant 2 : i32
    %120 = arith.index_cast %c2_i32 : i32 to index
    %c0_46 = arith.constant 0 : index
    %c0_47 = arith.constant 0 : index
    %121 = vector.load %arg10[%120, %c0_46, %c0_47] : memref<3x8x512xf32, #tpu.memory_space<vmem>>, vector<1x8x512xf32>
    %122 = vector.shape_cast %121 : vector<1x8x512xf32> to vector<8x512xf32>
    %cst_48 = arith.constant dense<0.000000e+00> : vector<8x512xf32>
    %123 = tpu.matmul %119, %12, %cst_48 {dimension_numbers = #tpu.dot_dimension_numbers<[1], [0], [0], [1], [0, 0, 1, 1], [], []>} : vector<8x128xf32>, vector<128x512xf32>, vector<8x512xf32> -> vector<8x512xf32>
    %124 = arith.addf %122, %123 : vector<8x512xf32>
    %125 = vector.extract_strided_slice %124 {offsets = [0, 0], sizes = [8, 128], strides = [1, 1]} : vector<8x512xf32> to vector<8x128xf32>
    %cst_49 = arith.constant 5.000000e-01 : f32
    %126 = vector.broadcast %cst_49 : f32 to vector<8x128xf32>
    %127 = arith.mulf %126, %125 : vector<8x128xf32>
    %128 = math.tanh %127 : vector<8x128xf32>
    %cst_50 = arith.constant 5.000000e-01 : f32
    %129 = vector.broadcast %cst_50 : f32 to vector<8x128xf32>
    %130 = arith.mulf %129, %128 : vector<8x128xf32>
    %cst_51 = arith.constant 5.000000e-01 : f32
    %131 = vector.broadcast %cst_51 : f32 to vector<8x128xf32>
    %132 = arith.addf %130, %131 : vector<8x128xf32>
    %133 = vector.extract_strided_slice %124 {offsets = [0, 128], sizes = [8, 128], strides = [1, 1]} : vector<8x512xf32> to vector<8x128xf32>
    %cst_52 = arith.constant 5.000000e-01 : f32
    %134 = vector.broadcast %cst_52 : f32 to vector<8x128xf32>
    %135 = arith.mulf %134, %133 : vector<8x128xf32>
    %136 = math.tanh %135 : vector<8x128xf32>
    %cst_53 = arith.constant 5.000000e-01 : f32
    %137 = vector.broadcast %cst_53 : f32 to vector<8x128xf32>
    %138 = arith.mulf %137, %136 : vector<8x128xf32>
    %cst_54 = arith.constant 5.000000e-01 : f32
    %139 = vector.broadcast %cst_54 : f32 to vector<8x128xf32>
    %140 = arith.addf %138, %139 : vector<8x128xf32>
    %141 = vector.extract_strided_slice %124 {offsets = [0, 256], sizes = [8, 128], strides = [1, 1]} : vector<8x512xf32> to vector<8x128xf32>
    %142 = math.tanh %141 : vector<8x128xf32>
    %143 = vector.extract_strided_slice %124 {offsets = [0, 384], sizes = [8, 128], strides = [1, 1]} : vector<8x512xf32> to vector<8x128xf32>
    %cst_55 = arith.constant 5.000000e-01 : f32
    %144 = vector.broadcast %cst_55 : f32 to vector<8x128xf32>
    %145 = arith.mulf %144, %143 : vector<8x128xf32>
    %146 = math.tanh %145 : vector<8x128xf32>
    %cst_56 = arith.constant 5.000000e-01 : f32
    %147 = vector.broadcast %cst_56 : f32 to vector<8x128xf32>
    %148 = arith.mulf %147, %146 : vector<8x128xf32>
    %cst_57 = arith.constant 5.000000e-01 : f32
    %149 = vector.broadcast %cst_57 : f32 to vector<8x128xf32>
    %150 = arith.addf %148, %149 : vector<8x128xf32>
    %151 = arith.mulf %140, %113 : vector<8x128xf32>
    %152 = arith.mulf %132, %142 : vector<8x128xf32>
    %153 = arith.addf %151, %152 : vector<8x128xf32>
    %154 = math.tanh %153 : vector<8x128xf32>
    %155 = arith.mulf %150, %154 : vector<8x128xf32>
    %156 = arith.addi %13, %c2_i32 : i32
    %c8_i32_58 = arith.constant 8 : i32
    %157 = arith.cmpi slt, %156, %c8_i32_58 : i32
    %158 = arith.extui %157 : i1 to i32
    %159 = arith.sitofp %158 : i32 to f32
    %160 = vector.broadcast %159 : f32 to vector<8x128xf32>
    %161 = arith.mulf %160, %153 : vector<8x128xf32>
    %cst_59 = arith.constant 1.000000e+00 : f32
    %162 = arith.subf %cst_59, %159 : f32
    %163 = vector.broadcast %162 : f32 to vector<8x128xf32>
    %164 = arith.mulf %163, %113 : vector<8x128xf32>
    %165 = arith.addf %161, %164 : vector<8x128xf32>
    %166 = vector.broadcast %159 : f32 to vector<8x128xf32>
    %167 = arith.mulf %166, %155 : vector<8x128xf32>
    %cst_60 = arith.constant 1.000000e+00 : f32
    %168 = arith.subf %cst_60, %159 : f32
    %169 = vector.broadcast %168 : f32 to vector<8x128xf32>
    %170 = arith.mulf %169, %119 : vector<8x128xf32>
    %171 = arith.addf %167, %170 : vector<8x128xf32>
    %c3_i32_61 = arith.constant 3 : i32
    %c0_62 = arith.constant 0 : index
    %c0_63 = arith.constant 0 : index
    %172 = vector.load %arg8[%c0_62, %c0_63] : memref<8x128xf32, #tpu.memory_space<vmem>>, vector<8x128xf32>
    tpu.vector_store %arg8[%c0_62, %c0_63], %171 {strides = array<i32>} : memref<8x128xf32, #tpu.memory_space<vmem>>, vector<8x128xf32>,
    %c0_64 = arith.constant 0 : index
    %c0_65 = arith.constant 0 : index
    %173 = vector.load %arg9[%c0_64, %c0_65] : memref<8x128xf32, #tpu.memory_space<vmem>>, vector<8x128xf32>
    tpu.vector_store %arg9[%c0_64, %c0_65], %165 {strides = array<i32>} : memref<8x128xf32, #tpu.memory_space<vmem>>, vector<8x128xf32>,
    %c2_i32_66 = arith.constant 2 : i32
    %174 = arith.cmpi eq, %arg0, %c2_i32_66 : i32
    %175 = arith.extui %174 : i1 to i32
    %c0_i32_67 = arith.constant 0 : i32
    %176 = arith.cmpi ne, %175, %c0_i32_67 : i32
    scf.if %176 {
      %c0_68 = arith.constant 0 : index
      %c0_69 = arith.constant 0 : index
      %177 = vector.load %arg5[%c0_68, %c0_69] : memref<128x128xf32, #tpu.memory_space<vmem>>, vector<128x128xf32>
      %cst_70 = arith.constant dense<0.000000e+00> : vector<8x128xf32>
      %178 = tpu.matmul %171, %177, %cst_70 {dimension_numbers = #tpu.dot_dimension_numbers<[1], [0], [0], [1], [0, 0, 1, 1], [], []>} : vector<8x128xf32>, vector<128x128xf32>, vector<8x128xf32> -> vector<8x128xf32>
      %c0_71 = arith.constant 0 : index
      %c0_72 = arith.constant 0 : index
      %179 = vector.load %arg6[%c0_71, %c0_72] : memref<1x128xf32, #tpu.memory_space<vmem>>, vector<1x128xf32>
      %180 = vector.broadcast %179 : vector<1x128xf32> to vector<8x128xf32>
      %181 = arith.addf %178, %180 : vector<8x128xf32>
      %c0_73 = arith.constant 0 : index
      %c0_74 = arith.constant 0 : index
      %182 = vector.load %arg7[%c0_73, %c0_74] : memref<8x128xf32, #tpu.memory_space<vmem>>, vector<8x128xf32>
      tpu.vector_store %arg7[%c0_73, %c0_74], %181 {strides = array<i32>} : memref<8x128xf32, #tpu.memory_space<vmem>>, vector<8x128xf32>,
    } else {
    }
    return
  }
  func.func @transform_0(%arg0: i32) -> (i32, i32, i32) {
    %c0_i32 = arith.constant 0 : i32
    %c0_i32_0 = arith.constant 0 : i32
    %c0_i32_1 = arith.constant 0 : i32
    return %arg0, %c0_i32, %c0_i32_0 : i32, i32, i32
  }
  func.func @transform_1(%arg0: i32) -> (i32, i32) {
    %c0_i32 = arith.constant 0 : i32
    %c0_i32_0 = arith.constant 0 : i32
    %c0_i32_1 = arith.constant 0 : i32
    return %c0_i32, %c0_i32_0 : i32, i32
  }
  func.func @transform_2(%arg0: i32) -> (i32, i32) {
    %c0_i32 = arith.constant 0 : i32
    %c0_i32_0 = arith.constant 0 : i32
    %c0_i32_1 = arith.constant 0 : i32
    return %c0_i32, %c0_i32_0 : i32, i32
  }
  func.func @transform_3(%arg0: i32) -> (i32, i32) {
    %c0_i32 = arith.constant 0 : i32
    %c0_i32_0 = arith.constant 0 : i32
    %c0_i32_1 = arith.constant 0 : i32
    return %c0_i32, %c0_i32_0 : i32, i32
  }
  func.func @transform_4(%arg0: i32) -> (i32, i32) {
    %c0_i32 = arith.constant 0 : i32
    %c0_i32_0 = arith.constant 0 : i32
    %c0_i32_1 = arith.constant 0 : i32
    return %c0_i32, %c0_i32_0 : i32, i32
  }
  func.func @transform_5(%arg0: i32) -> (i32, i32) {
    %c0_i32 = arith.constant 0 : i32
    %c0_i32_0 = arith.constant 0 : i32
    %c0_i32_1 = arith.constant 0 : i32
    return %c0_i32, %c0_i32_0 : i32, i32
  }
  func.func @transform_6(%arg0: i32) -> (i32, i32) {
    %c0_i32 = arith.constant 0 : i32
    %c0_i32_0 = arith.constant 0 : i32
    %c0_i32_1 = arith.constant 0 : i32
    return %c0_i32, %c0_i32_0 : i32, i32
  }
}

</mosaic_0001>

<bundles_post_ra>
// kernel: tpu_custom_call.1
= control target key start
LH: loop header
LB: loop body
LE: loop exit
PB: predicated region body
PF: predicated region fallthrough
CT: control target
= control target key end

     0   :  { %11 = vsyncpa [#allocation6], 0  ;;  %s2471_s0 = inlined_call_operand.hbm [shape: f32[9,8,16], index: 0, kind: input, shape index: {}]   ;;  %s2472_s1 = inlined_call_operand.hbm [shape: f32[16,512], index: 1, kind: input, shape index: {}]   ;;  %s2473_s2 = inlined_call_operand.vmem [shape: f32[1,512], index: 2, kind: input, shape index: {}]   ;;  %s2474_s3 = inlined_call_operand.hbm [shape: f32[128,512], index: 3, kind: input, shape index: {}]   ;;  %s2475_s4 = inlined_call_operand.hbm [shape: f32[128,128], index: 4, kind: input, shape index: {}]   ;;  %s2476_s5 = inlined_call_operand.vmem [shape: f32[1,128], index: 5, kind: input, shape index: {}]   ;;  %s2477_s6 = inlined_call_operand.hbm [shape: f32[8,128], index: 6, kind: output, shape index: {}]  }
   0x1   :  { %13 = vsyncpa [#allocation6 + $0x1], 0 }
   0x2   :  { %14 = vsyncpa [#allocation9], 0 }
   0x3   :  { %15 = vsyncpa [#allocation12], 0 }
   0x4   :  { %16 = vsyncpa [#allocation7], 0  ;;  %s2007_s21 = smov 0   ;;  %s2009_s22 = smov 0  }
   0x5   :  { %s2011_s23 = smov 0   ;;  %s2013_s24 = smov 0  }
   0x6 LB: > { %s2026_s25 = sadd.s32 4294967295, %s1956_s24   ;;  %p42_p0 = scmp.ne.s32.totalorder %s1948_s22, %s1944_s21  ;;  %s1956_s24 = sphi %s2013_s24, %s2496_s24   ;;  %s1952_s23 = sphi %s2011_s23, %s2495_s23   ;;  %s1948_s22 = sphi %s2009_s22, %s2494_s22   ;;  %s1944_s21 = sphi %s2007_s21, %s2493_s21  }
   0x7   : > { %p2478_p1 = scmp.eq.s32.totalorder %s2026_s25, 0  ;;  %p1328_p2 = scmp.ge.s32.totalorder %s1956_s24, 1 }
   0x8   : > { %p179_p3 = scmp.lt.s32.totalorder %s1956_s24, 4  ;;  %s1958_s28 = smov [#allocation8]  }
   0x9   : > { %p2035_p5 = por %p2478_p1, %p42_p0  ;;  %s191_s29 = sshll.u32 %s1958_s28, 4  ;;  %s2043_s29 = int_to_ptr.vmem [resolvable:$true] %s191_s29 }
   0xa   : > { %p2039_p6 = pnand %p1328_p2, %p179_p3  ;;  %s1959_s7 = smov [#allocation10]  }
   0xb   : > { %s2481_s26 = scalar_select %p2035_p5, 1, 0 }
   0xc   : > { %s2482_s27 = scalar_select %p2039_p6, 1, 0 }
   0xd   : > { %p1672_p7 = pneg %p2039_p6  ;;  %s207_s8 = sshll.u32 %s1959_s7, 4  ;;  %s2053_s8 = int_to_ptr.vmem [resolvable:$true] %s207_s8 }
   0xe   : > { %s1960_s9 = smov [#allocation11]   ;;  %s1770_s13 = scalar_lea.hbm %s2472_s1, 1024 }
   0xf   : > { %p2049_p8 = pnand %p1672_p7, %p2478_p1  ;;  %s2055_s10 = sshll.u32 %s1960_s9, 4  ;;  %s221_s10 = int_to_ptr.vmem [resolvable:$true] %s2055_s10 }
  0x10   : > { %p1771_p9 = scmp.ne.s32.totalorder %s2472_s1, %s1770_s13  ;;  %p1777_p13 = scmp.lt.u32.totalorder %s1770_s13, %s2472_s1 }
  0x11   : > { %p2065_p10 = pneg %p2049_p8 }
  0x13   : > { %p1773_p11 = pnand %p2065_p10, %p1771_p9 }
  0x15   : > { %p1774_p12 = pneg %p1773_p11 }
  0x17   : > { %p1779_p0 = pnand %p1777_p13, %p1774_p12 }
  0x19   : > { %1782 = shalt.err (!%p1779_p0)
}
  0x1a   : > { %s1783_s19 = scalar_lea.vmem %s2043_s29, 1024  ;;  %p1791_p4 = scmp.lt.s32.totalorder %s2043_s29, %s2043_s29 }
  0x1b   : > { %p1784_p2 = scmp.ne.s32.totalorder %s2043_s29, %s1783_s19  ;;  %p1792_p1 = scmp.lt.s32.totalorder %s1783_s19, %s1783_s19 }
  0x1d   : > { %p1786_p3 = pnand %p1784_p2, %p2065_p10  ;;  %p1793_p9 = por %p1792_p1, %p1791_p4 }
  0x1f   : > { %p1787_p7 = pneg %p1786_p3 }
  0x21   : > { %p1794_p11 = pnand %p1793_p9, %p1787_p7 }
  0x23   : > { %1797 = shalt.err (!%p1794_p11)
}
  0x24   : > { %s1961_s20 = smov 512   ;;  %s1962_s21 = smov 32  }
  0x25   : > { %1675 = dma.hbm_to_vmem [thread:$0]  (!%p2049_p8), %s2472_s1, 1024, %s2043_s29, [#allocation9], %s1961_s20, %s1961_s20, %s1962_s21  }
  0x26   : > { %s1798_s12 = scalar_lea.hbm %s2474_s3, 8192 }
  0x27   : > { %p1799_p1 = scmp.ne.s32.totalorder %s2474_s3, %s1798_s12  ;;  %p1805_p13 = scmp.lt.u32.totalorder %s1798_s12, %s2474_s3 }
  0x29   : > { %p1801_p4 = pnand %p1799_p1, %p2065_p10 }
  0x2b   : > { %p1802_p12 = pneg %p1801_p4 }
  0x2d   : > { %p1807_p0 = pnand %p1805_p13, %p1802_p12 }
  0x2f   : > { %1810 = shalt.err (!%p1807_p0)
}
  0x30   : > { %s1811_s29 = scalar_lea.vmem %s2053_s8, 8192  ;;  %p1819_p9 = scmp.lt.s32.totalorder %s2053_s8, %s2053_s8 }
  0x31   : > { %p1812_p2 = scmp.ne.s32.totalorder %s2053_s8, %s1811_s29  ;;  %p1820_p11 = scmp.lt.s32.totalorder %s1811_s29, %s1811_s29 }
  0x33   : > { %p1814_p3 = pnand %p1812_p2, %p2065_p10  ;;  %p1821_p1 = por %p1820_p11, %p1819_p9 }
  0x35   : > { %p1815_p7 = pneg %p1814_p3 }
  0x37   : > { %p1822_p4 = pnand %p1821_p1, %p1815_p7 }
  0x39   : > { %1825 = shalt.err (!%p1822_p4)
}
  0x3a   : > { %1678 = dma.hbm_to_vmem [thread:$0]  (!%p2049_p8), %s2474_s3, 8192, %s2053_s8, [#allocation9], %s1961_s20, %s1961_s20, %s1962_s21  }
  0x3b   : > { %s1826_s9 = scalar_lea.hbm %s2475_s4, 2048 }
  0x3c   : > { %p1827_p12 = scmp.ne.s32.totalorder %s2475_s4, %s1826_s9  ;;  %p1833_p2 = scmp.lt.u32.totalorder %s1826_s9, %s2475_s4 }
  0x3e   : > { %p1829_p13 = pnand %p1827_p12, %p2065_p10 }
  0x40   : > { %p1830_p0 = pneg %p1829_p13 }
  0x42   : > { %p1835_p3 = pnand %p1833_p2, %p1830_p0 }
  0x44   : > { %1838 = shalt.err (!%p1835_p3)
}
  0x45   : > { %s1839_s15 = scalar_lea.vmem %s221_s10, 2048  ;;  %p1847_p1 = scmp.lt.s32.totalorder %s221_s10, %s221_s10 }
  0x46   : > { %p1840_p7 = scmp.ne.s32.totalorder %s221_s10, %s1839_s15  ;;  %p1848_p4 = scmp.lt.s32.totalorder %s1839_s15, %s1839_s15 }
  0x48   : > { %p1842_p9 = pnand %p1840_p7, %p2065_p10  ;;  %p1849_p5 = por %p1848_p4, %p1847_p1 }
  0x4a   : > { %p1843_p11 = pneg %p1842_p9 }
  0x4c   : > { %p1850_p6 = pnand %p1849_p5, %p1843_p11 }
  0x4e   : > { %1853 = shalt.err (!%p1850_p6)
}
  0x4f   : > { %s1963_s8 = smov 128   ;;  %s1964_s16 = smov 8  }
  0x50   : > { %1681 = dma.hbm_to_vmem [thread:$0]  (!%p2049_p8), %s2475_s4, 2048, %s221_s10, [#allocation12], %s1963_s8, %s1963_s8, %s1964_s16  }
  0x51   : > { %s2132_s17 = sadd.s32 1, %s1956_s24   ;;  %s29_s18 = sadd.s32 1, %s1952_s23 }
  0x52   : > { %s26_s29 = ssub.s32 %s1956_s24, %s2132_s17  ;;  %p36_p6 = scmp.ne.s32.totalorder %s1952_s23, %s1948_s22 }
  0x53   : > { %p27_p5 = scmp.eq.s32.totalorder %s26_s29, 0  ;;  %p37_p10 = scmp.eq.s32.totalorder %s1956_s24, 0 }
  0x54   : > { %p1689_p12 = scmp.lt.s32.totalorder %s1956_s24, 3  ;;  %s237_s30 = sand.u32 1, %s1952_s23  }
  0x55   : > { %s2142_s19 = scalar_select %p27_p5, %s1952_s23, %s29_s18  }
  0x56   : > { %p38_p13 = por %p37_p10, %p36_p6  ;;  %s1652_s28 = smul.u32 24, %s237_s30 }
  0x57   : > { %s1351_s7 = smul.u32 384, %s1956_s24  ;;  %s2157_s24 = scalar_lea.sflag [#allocation6], %s237_s30 }
  0x58   : > { %p2146_p0 = pnand %p1689_p12, %p38_p13  ;;  %s241_s13 = scalar_lea.vmem [#allocation5], %s1652_s28 }
  0x59   : > { %s2153_s12 = scalar_lea.hbm %s2471_s0, %s1351_s7  ;;  %s248_s14 = sshll.u32 %s241_s13, 4  ;;  %s2155_s14 = int_to_ptr.vmem [resolvable:$true] %s248_s14 }
  0x5a   : > { %s1854_s15 = scalar_lea.hbm %s2153_s12, 384  ;;  %p1856_p2 = pneg %p2146_p0 }
  0x5b   : > { %p1855_p8 = scmp.ne.s32.totalorder %s2153_s12, %s1854_s15  ;;  %s1859_s29 = scalar_lea.hbm %s2471_s0, 1152 }
  0x5c   : > { %p1860_p9 = scmp.lt.u32.totalorder %s2153_s12, %s2471_s0  ;;  %p1861_p11 = scmp.lt.u32.totalorder %s1859_s29, %s1854_s15 }
  0x5d   : > { %p1857_p3 = pnand %p1856_p2, %p1855_p8  ;;  %p1863_p4 = scmp.lt.u32.totalorder %s1854_s15, %s2153_s12 }
  0x5e   : > { %p1862_p1 = por %p1861_p11, %p1860_p9 }
  0x5f   : > { %p1858_p7 = pneg %p1857_p3 }
  0x60   : > { %p1864_p5 = por %p1863_p4, %p1862_p1 }
  0x62   : > { %p1865_p6 = pnand %p1864_p5, %p1858_p7 }
  0x64   : > { %1868 = shalt.err (!%p1865_p6)
}
  0x65   : > { %s1869_s30 = scalar_lea.vmem %s2155_s14, 384  ;;  %s1965_s28 = smov [#allocation5]  }
  0x66   : > { %p1870_p10 = scmp.ne.s32.totalorder %s2155_s14, %s1869_s30  ;;  %s1874_s10 = sshll.u32 %s1965_s28, 4  ;;  %s1875_s10 = int_to_ptr.vmem [resolvable:$false] %s1874_s10 }
  0x67   : > { %s1876_s11 = scalar_lea.vmem %s1875_s10, 768  ;;  %p1877_p8 = scmp.lt.s32.totalorder %s2155_s14, %s1875_s10 }
  0x68   : > { %p1872_p12 = pnand %p1870_p10, %p1856_p2  ;;  %p1878_p3 = scmp.lt.s32.totalorder %s1876_s11, %s1869_s30 }
  0x6a   : > { %p1873_p13 = pneg %p1872_p12  ;;  %p1879_p9 = por %p1878_p3, %p1877_p8 }
  0x6c   : > { %p1880_p11 = pnand %p1879_p9, %p1873_p13 }
  0x6e   : > { %1883 = shalt.err (!%p1880_p11)
}
  0x6f   : > { %1685 = dma.hbm_to_vmem [thread:$0]  (!%p2146_p0), %s2153_s12, 384, %s2155_s14, %s2157_s24, %s1963_s8, %s1963_s8, %s1964_s16  }
  0x70   : > { %p2486_p2 = scmp.ne.s32.totalorder %s2482_s27, 0 }
  0x71   : > { %s262_s13 = sand.u32 (!%p2486_p2), 1, %s1948_s22   ;;  %p2487_p7 = scmp.ne.s32.totalorder (!%p2486_p2), %s2481_s26, 0 }
  0x72   : > { %260 = sbr.rel (%p2486_p2) target bundleno = 1177 (0x499), region = 44  ;;  %s263_s20 = scalar_lea.sflag (!%p2486_p2), [#allocation6], %s262_s13 }
  0x73   : > { %s1653_s15 = smul.u32 (!%p2486_p2), 24, %s262_s13 }
  0x75   : > { %s2191_s21 = scalar_lea.vmem (!%p2486_p2), [#allocation5], %s1653_s15 }
  0x79   : > { %1927 = dma.done.wait (%p2487_p7), %s263_s20, 384  }
  0x7a   : > { %1929 = vsyncadd (%p2487_p7), %s263_s20, 4294966912  ;;  %p2488_p1 = scmp.eq.s32.totalorder %s2026_s25, 0 }
  0x7c   : > { %1931 = dma.done.wait (%p2488_p1), [#allocation9], 9216   ;;  %p2489_p0 = pmov %p2488_p1 }
  0x7e   : > { %1933 = vsyncadd (%p2489_p0), [#allocation9], 4294958080  ;;  %p2490_p4 = pmov %p2489_p0 }
  0x7f   : > { %p2491_p5 = pmov %p2489_p0 }
  0x80   : > { %1935 = dma.done.wait (%p2490_p4), [#allocation12], 2048  }
  0x81   : > { %1937 = vsyncadd (%p2491_p5), [#allocation12], 4294965248  ;;  %p2492_p6 = scmp.ne.s32.totalorder %s2026_s25, 0 }
  0x82   : > { %v1966_v0 = vmov (!%p2492_p6), 0.0  }
  0x83   : > { %306 = sbr.rel (%p2492_p6) target bundleno = 138 (0x8a), region = 64  ;;  %307 = vst [vmem:[#allocation2] sm:$0xff] (!%p2492_p6), %v1966_v0  ;;  %308 = vst [vmem:[#allocation3] sm:$0xff] (!%p2492_p6), %v1966_v0 }
  0x8a PF: > { %v313_v1 = vld [vmem:[#allocation8 + $0x8] sm:$0xff]  ;;  %v315_v3 = vld [vmem:[#allocation8 + $0x18] sm:$0xff]  ;;  %v312_v6 = vld [vmem:[#allocation8] sm:$0xff]  ;;  %v1967_v8 = vmov 0.0   ;;  %vm342_vm0 = vcmask 130048   ;;  %s2368_s8 = smul.u32 3, %s2026_s25 }
  0x8b   : > { %v317_v2 = vld [vmem:[#allocation8 + $0x28] sm:$0xff]  ;;  %v319_v5 = vld [vmem:[#allocation8 + $0x38] sm:$0xff]  ;;  %v316_v7 = vld [vmem:[#allocation8 + $0x20] sm:$0xff]  ;;  %416 = vmatprep.mubr.f32.mxu0 %v1967_v8  ;;  %499 = vmatprep.mubr.f32.mxu1 %v1967_v8  ;;  %p1345_p8 = scmp.ne.s32.totalorder %s2026_s25, 2 }
  0x8c   : > { %v1404_v4 = vpack.c.bf16 %v317_v2, %v313_v1  ;;  %v1408_v9 = vpack.c.bf16 %v319_v5, %v315_v3  ;;  %v1406_v10 = vpack.c.bf16 %v316_v7, %v312_v6  ;;  %v314_v11 = vld [vmem:[#allocation8 + $0x10] sm:$0xff]  ;;  %v531_v13 = vld [vmem:[#allocation10 + $0x8] sm:$0xff]  ;;  %v533_v16 = vld [vmem:[#allocation10 + $0x18] sm:$0xff]  ;;  %p765_p10 = scmp.lt.s32.totalorder %s2368_s8, 8  ;;  %s946_s14 = sadd.s32 1, %s2368_s8  ;;  %vm1969_vm1 = vmmov (!%p1345_p8), 0  }
  0x8d   : > { %v318_v12 = vld [vmem:[#allocation8 + $0x30] sm:$0xff]  ;;  %v535_v15 = vld [vmem:[#allocation10 + $0x28] sm:$0xff]  ;;  %v537_v17 = vld [vmem:[#allocation10 + $0x38] sm:$0xff]  ;;  %p947_p12 = scmp.lt.s32.totalorder %s946_s14, 8  ;;  %s1128_s7 = sadd.s32 2, %s2368_s8 }
  0x8e   : > { %1405 = vmatprep.subr.bf16.mxu0 %v1404_v4  ;;  %v1410_v14 = vpack.c.bf16 %v318_v12, %v314_v11  ;;  %1409 = vmatprep.subr.bf16.mxu1 %v1408_v9  ;;  %v2209_v18 = vpack.c.bf16 %v535_v15, %v531_v13  ;;  %v2211_v19 = vpack.c.bf16 %v537_v17, %v533_v16  ;;  %v309_v20 = vld [vmem:[%s2191_s21] sm:$0xff]  ;;  %v530_v21 = vld [vmem:[#allocation10] sm:$0xff]  ;;  %v541_v29 = vld [vmem:[#allocation10 + $0x58] sm:$0xff]  ;;  %s766_s16 = scalar_select %p765_p10, 1, 0 }
  0x8f   : > { %1407 = vmatpush1.bf16.msra.mxu0 %v1406_v10  ;;  %v534_v22 = vld [vmem:[#allocation10 + $0x20] sm:$0xff]  ;;  %v532_v24 = vld [vmem:[#allocation10 + $0x10] sm:$0xff]  ;;  %v539_v26 = vld [vmem:[#allocation10 + $0x48] sm:$0xff]  ;;  %s948_s24 = scalar_select %p947_p12, 1, 0 }
  0x90   : > { %1411 = vmatpush1.bf16.msra.mxu1 %v1410_v14  ;;  %v2214_v23 = vpack.c.bf16 %v534_v22, %v530_v21  ;;  %v536_v25 = vld [vmem:[#allocation10 + $0x30] sm:$0xff]  ;;  %1413 = vmatprep.subr.bf16.mxu0 %v2209_v18  ;;  %v543_v28 = vld [vmem:[#allocation10 + $0x68] sm:$0xff]  ;;  %v545_v30 = vld [vmem:[#allocation10 + $0x78] sm:$0xff]  ;;  %s767_s9 = scvt.s32.f32 %s766_s16  ;;  %p1129_p13 = scmp.lt.s32.totalorder %s1128_s7, 8 }
  0x91   : > { %1445 = vmatprep.subr.bf16.mxu1 %v2211_v19  ;;  %v2218_v27 = vpack.c.bf16 %v536_v25, %v532_v24  ;;  %v2221_v31 = vpack.c.bf16 %v543_v28, %v539_v26  ;;  %v2223_v32 = vpack.c.bf16 %v545_v30, %v541_v29  ;;  %v538_v33 = vld [vmem:[#allocation10 + $0x40] sm:$0xff]  ;;  %v540_v35 = vld [vmem:[#allocation10 + $0x50] sm:$0xff]  ;;  %v547_v38 = vld [vmem:[#allocation10 + $0x88] sm:$0xff]  ;;  %s949_s29 = scvt.s32.f32 %s948_s24 }
  0x92   : > { %1339 = vmatmul.mubr.msk.f32.vlgmr.msra.gmra.mrb[0].mxu0 %vm342_vm0, %v309_v20  ;;  %v542_v34 = vld [vmem:[#allocation10 + $0x60] sm:$0xff]  ;;  %v544_v37 = vld [vmem:[#allocation10 + $0x70] sm:$0xff]  ;;  %v551_v39 = vld [vmem:[#allocation10 + $0xa8] sm:$0xff]  ;;  %s770_s12 = ssub.f32 1.0, %s767_s9 }
  0x93   : > { %1342 = vmatmul.mubr.msk.f32.vlgmr.msra.gmra.mrb[0].mxu1 %vm342_vm0, %v309_v20  ;;  %1415 = vmatpush1.bf16.msra.mxu0 %v2214_v23  ;;  %v2227_v36 = vpack.c.bf16 %v542_v34, %v538_v33  ;;  %v2231_v40 = vpack.c.bf16 %v544_v37, %v540_v35  ;;  %v2233_v41 = vpack.c.bf16 %v551_v39, %v547_v38  ;;  %v549_v42 = vld [vmem:[#allocation10 + $0x98] sm:$0xff]  ;;  %v546_v44 = vld [vmem:[#allocation10 + $0x80] sm:$0xff]  ;;  %v548_v47 = vld [vmem:[#allocation10 + $0x90] sm:$0xff]  ;;  %s952_s18 = ssub.f32 1.0, %s949_s29 }
  0x94   : > { %1447 = vmatpush1.bf16.msra.mxu1 %v2218_v27  ;;  %1417 = vmatprep.subr.bf16.mxu0 %v2221_v31  ;;  %v553_v43 = vld [vmem:[#allocation10 + $0xb8] sm:$0xff]  ;;  %v550_v46 = vld [vmem:[#allocation10 + $0xa0] sm:$0xff]  ;;  %v552_v48 = vld [vmem:[#allocation10 + $0xb0] sm:$0xff]  ;;  %s1130_s30 = scalar_select %p1129_p13, 1, 0 }
  0x95   : > { %1449 = vmatprep.subr.bf16.mxu1 %v2223_v32  ;;  %v2236_v45 = vpack.c.bf16 %v553_v43, %v549_v42  ;;  %422 = vmatprep.mubr.f32.mxu0 %v1967_v8  ;;  %v555_v49 = vld [vmem:[#allocation10 + $0xc8] sm:$0xff]  ;;  %v557_v51 = vld [vmem:[#allocation10 + $0xd8] sm:$0xff]  ;;  %v2241_v52 = vpack.c.bf16 %v550_v46, %v546_v44  ;;  %v2245_v54 = vpack.c.bf16 %v552_v48, %v548_v47  ;;  %v554_v56 = vld [vmem:[#allocation10 + $0xc0] sm:$0xff] }
  0x96   : > { %v559_v50 = vld [vmem:[#allocation10 + $0xe8] sm:$0xff]  ;;  %505 = vmatprep.mubr.f32.mxu1 %v1967_v8  ;;  %v561_v53 = vld [vmem:[#allocation10 + $0xf8] sm:$0xff]  ;;  %v558_v57 = vld [vmem:[#allocation10 + $0xe0] sm:$0xff]  ;;  %s1131_s28 = scvt.s32.f32 %s1130_s30 }
  0x97   : > { %1419 = vmatpush1.bf16.msra.mxu0 %v2227_v36  ;;  %v2247_v55 = vpack.c.bf16 %v559_v50, %v555_v49  ;;  %v556_v58 = vld [vmem:[#allocation10 + $0xd0] sm:$0xff]  ;;  %v2250_v59 = vpack.c.bf16 %v561_v53, %v557_v51  ;;  %v563_v61 = vld [vmem:[#allocation10 + $0x108] sm:$0xff]  ;;  %v565_v63 = vld [vmem:[#allocation10 + $0x118] sm:$0xff]  ;;  %v2253_v1 = vpack.c.bf16 %v558_v57, %v554_v56 }
  0x98   : > { %1451 = vmatpush1.bf16.msra.mxu1 %v2231_v40  ;;  %1421 = vmatprep.subr.bf16.mxu0 %v2233_v41  ;;  %v560_v60 = vld [vmem:[#allocation10 + $0xf0] sm:$0xff]  ;;  %v567_v62 = vld [vmem:[#allocation10 + $0x128] sm:$0xff]  ;;  %v569_v0 = vld [vmem:[#allocation10 + $0x138] sm:$0xff]  ;;  %s1134_s10 = ssub.f32 1.0, %s1131_s28 }
  0x99   : > { %1453 = vmatprep.subr.bf16.mxu1 %v2236_v45  ;;  %v2257_v2 = vpack.c.bf16 %v560_v60, %v556_v58  ;;  %v2259_v3 = vpack.c.bf16 %v567_v62, %v563_v61  ;;  %v562_v4 = vld [vmem:[#allocation10 + $0x100] sm:$0xff]  ;;  %v564_v6 = vld [vmem:[#allocation10 + $0x110] sm:$0xff]  ;;  %v2262_v7 = vpack.c.bf16 %v569_v0, %v565_v63  ;;  %v571_v10 = vld [vmem:[#allocation10 + $0x148] sm:$0xff] }
  0x9a   : > { %v566_v5 = vld [vmem:[#allocation10 + $0x120] sm:$0xff]  ;;  %v568_v9 = vld [vmem:[#allocation10 + $0x130] sm:$0xff]  ;;  %v575_v11 = vld [vmem:[#allocation10 + $0x168] sm:$0xff] }
  0x9b   : > { %1423 = vmatpush1.bf16.msra.mxu0 %v2241_v52  ;;  %v573_v12 = vld [vmem:[#allocation10 + $0x158] sm:$0xff]  ;;  %v2266_v15 = vpack.c.bf16 %v566_v5, %v562_v4  ;;  %v570_v16 = vld [vmem:[#allocation10 + $0x140] sm:$0xff]  ;;  %v2271_v17 = vpack.c.bf16 %v568_v9, %v564_v6  ;;  %v2273_v20 = vpack.c.bf16 %v575_v11, %v571_v10  ;;  %v572_v22 = vld [vmem:[#allocation10 + $0x150] sm:$0xff]  ;;  %v322_v4 = vlaneseq }
  0x9c   : > { %1455 = vmatpush1.bf16.msra.mxu1 %v2245_v54  ;;  %1425 = vmatprep.subr.bf16.mxu0 %v2247_v55  ;;  %v577_v13 = vld [vmem:[#allocation10 + $0x178] sm:$0xff]  ;;  %v574_v21 = vld [vmem:[#allocation10 + $0x160] sm:$0xff]  ;;  %v576_v24 = vld [vmem:[#allocation10 + $0x170] sm:$0xff] }
  0x9d   : > { %1457 = vmatprep.subr.bf16.mxu1 %v2250_v59  ;;  %v310_v14 = vld [vmem:[%s2191_s21 + $0x8] sm:$0xff]  ;;  %v2276_v25 = vpack.c.bf16 %v577_v13, %v573_v12  ;;  %v579_v26 = vld [vmem:[#allocation10 + $0x188] sm:$0xff]  ;;  %v311_v29 = vld [vmem:[%s2191_s21 + $0x10] sm:$0xff]  ;;  %v2283_v34 = vpack.c.bf16 %v574_v21, %v570_v16  ;;  %v2288_v35 = vpack.c.bf16 %v576_v24, %v572_v22  ;;  %v323_v5 = vshrl.u32 %v322_v4, 7 }
  0x9e   : > { %1343 = vmatmul.mubr.msk.f32.gmra.mrb[2].mxu1 %vm342_vm0, %v310_v14  ;;  %1340 = vmatmul.mubr.msk.f32.gmra.mrb[2].mxu0 %vm342_vm0, %v310_v14  ;;  %v583_v28 = vld [vmem:[#allocation10 + $0x1a8] sm:$0xff]  ;;  %v581_v30 = vld [vmem:[#allocation10 + $0x198] sm:$0xff]  ;;  %v578_v38 = vld [vmem:[#allocation10 + $0x180] sm:$0xff] }
  0x9f   : > { %1427 = vmatpush1.bf16.msra.mxu0 %v2253_v1  ;;  %v585_v33 = vld [vmem:[#allocation10 + $0x1b8] sm:$0xff]  ;;  %428 = vmatprep.mubr.f32.mxu0 %v1967_v8  ;;  %v2290_v37 = vpack.c.bf16 %v583_v28, %v579_v26  ;;  %v582_v39 = vld [vmem:[#allocation10 + $0x1a0] sm:$0xff]  ;;  %v580_v42 = vld [vmem:[#allocation10 + $0x190] sm:$0xff]  ;;  %v324_v6 = vsub.s32 0, %v323_v5  ;;  %v328_v10 = vsub.s32 1, %v323_v5  ;;  %v332_v12 = vsub.s32 2, %v323_v5 }
  0xa0   : > { %1459 = vmatpush1.bf16.msra.mxu1 %v2257_v2  ;;  %1429 = vmatprep.subr.bf16.mxu0 %v2259_v3  ;;  %v2293_v43 = vpack.c.bf16 %v585_v33, %v581_v30  ;;  %v584_v44 = vld [vmem:[#allocation10 + $0x1b0] sm:$0xff]  ;;  %v587_v46 = vld [vmem:[#allocation10 + $0x1c8] sm:$0xff]  ;;  %v589_v48 = vld [vmem:[#allocation10 + $0x1d8] sm:$0xff]  ;;  %v2299_v50 = vpack.c.bf16 %v582_v39, %v578_v38  ;;  %v336_v22 = vsub.s32 3, %v323_v5  ;;  %v768_v5 = vstv %s767_s9 }
  0xa1   : > { %1461 = vmatprep.subr.bf16.mxu1 %v2262_v7  ;;  %511 = vmatprep.mubr.f32.mxu1 %v1967_v8  ;;  %v591_v47 = vld [vmem:[#allocation10 + $0x1e8] sm:$0xff]  ;;  %v593_v49 = vld [vmem:[#allocation10 + $0x1f8] sm:$0xff]  ;;  %v2303_v51 = vpack.c.bf16 %v584_v44, %v580_v42  ;;  %v586_v56 = vld [vmem:[#allocation10 + $0x1c0] sm:$0xff] }
  0xa2   : > { %1344 = vmatmul.mubr.msk.f32.gmra.mrb[4].mxu1 %vm342_vm0, %v311_v29  ;;  %1341 = vmatmul.mubr.msk.f32.gmra.mrb[4].mxu0 %vm342_vm0, %v311_v29  ;;  %v2305_v53 = vpack.c.bf16 %v591_v47, %v587_v46  ;;  %v590_v57 = vld [vmem:[#allocation10 + $0x1e0] sm:$0xff]  ;;  %v2308_v58 = vpack.c.bf16 %v593_v49, %v589_v48  ;;  %v588_v60 = vld [vmem:[#allocation10 + $0x1d0] sm:$0xff]  ;;  %v596_v49 = vld [vmem:[#allocation3] sm:$0xff] }
  0xa3   : > { %1431 = vmatpush1.bf16.msra.mxu0 %v2266_v15  ;;  %665 = vmatprep.mubr.f32.mxu0 %v1967_v8  ;;  %v592_v61 = vld [vmem:[#allocation10 + $0x1f0] sm:$0xff]  ;;  %v2311_v62 = vpack.c.bf16 %v590_v57, %v586_v56  ;;  %v2319_v0 = vld [vmem:[#allocation2] sm:$0xff] }
  0xa4   : > { %1463 = vmatpush1.bf16.msra.mxu1 %v2271_v17  ;;  %1433 = vmatprep.subr.bf16.mxu0 %v2273_v20  ;;  %v2315_v63 = vpack.c.bf16 %v592_v61, %v588_v60  ;;  %v320_v9 = vld [vmem:[%s2473_s2] sm:$0xf]  ;;  %v771_v61 = vstv %s770_s12 }
  0xa5   : > { %1465 = vmatprep.subr.bf16.mxu1 %v2276_v25  ;;  %736 = vmatprep.mubr.f32.mxu1 %v1967_v8  ;;  %v2363_v11 = vrot.slane %v320_v9, %v324_v6  ;;  %v2365_v13 = vrot.slane %v320_v9, %v328_v10  ;;  %v2376_v33 = vrot.slane %v320_v9, %v336_v22 }
  0xa7   : > { %1435 = vmatpush1.bf16.msra.mxu0 %v2283_v34 }
  0xa8   : > { %1467 = vmatpush1.bf16.msra.mxu1 %v2288_v35  ;;  %1437 = vmatprep.subr.bf16.mxu0 %v2290_v37 }
  0xa9   : > { %1469 = vmatprep.subr.bf16.mxu1 %v2293_v43 }
  0xab   : > { %1439 = vmatpush1.bf16.msra.mxu0 %v2299_v50 }
  0xac   : > { %1471 = vmatpush1.bf16.msra.mxu1 %v2303_v51  ;;  %1441 = vmatprep.subr.bf16.mxu0 %v2305_v53 }
  0xad   : > { %1473 = vmatprep.subr.bf16.mxu1 %v2308_v58 }
  0xaf   : > { %1443 = vmatpush1.bf16.msra.mxu0 %v2311_v62 }
  0xb0   : > { %1475 = vmatpush1.bf16.msra.mxu1 %v2315_v63  ;;  %1477 = vmatprep.subr.bf16.mxu0 %v2209_v18 }
  0xb1   : > { %1509 = vmatprep.subr.bf16.mxu1 %v2211_v19 }
  0xb2   : > { %666 = vmatmul.mubr.f32.vlgmr.msra.gmra.mrb[0].mxu0 %v2319_v0 }
  0xb3   : > { %737 = vmatmul.mubr.f32.vlgmr.msra.gmra.mrb[0].mxu1 %v2319_v0  ;;  %1479 = vmatpush1.bf16.msra.mxu0 %v2214_v23 }
  0xb4   : > { %1511 = vmatpush1.bf16.msra.mxu1 %v2218_v27  ;;  %1481 = vmatprep.subr.bf16.mxu0 %v2221_v31 }
  0xb5   : > { %1513 = vmatprep.subr.bf16.mxu1 %v2223_v32  ;;  %846 = vmatprep.mubr.f32.mxu0 %v1967_v8 }
  0xb6   : > { %917 = vmatprep.mubr.f32.mxu1 %v1967_v8 }
  0xb7   : > { %1483 = vmatpush1.bf16.msra.mxu0 %v2227_v36 }
  0xb8   : > { %1515 = vmatpush1.bf16.msra.mxu1 %v2231_v40  ;;  %1485 = vmatprep.subr.bf16.mxu0 %v2233_v41 }
  0xb9   : > { %1517 = vmatprep.subr.bf16.mxu1 %v2236_v45 }
  0xbb   : > { %1487 = vmatpush1.bf16.msra.mxu0 %v2241_v52 }
  0xbc   : > { %1519 = vmatpush1.bf16.msra.mxu1 %v2245_v54  ;;  %1489 = vmatprep.subr.bf16.mxu0 %v2247_v55 }
  0xbd   : > { %1521 = vmatprep.subr.bf16.mxu1 %v2250_v59 }
  0xbf   : > { %1491 = vmatpush1.bf16.msra.mxu0 %v2253_v1 }
  0xc0   : > { %1523 = vmatpush1.bf16.msra.mxu1 %v2257_v2  ;;  %1493 = vmatprep.subr.bf16.mxu0 %v2259_v3 }
  0xc1   : > { %1525 = vmatprep.subr.bf16.mxu1 %v2262_v7 }
  0xc3   : > { %1495 = vmatpush1.bf16.msra.mxu0 %v2266_v15 }
  0xc4   : > { %1527 = vmatpush1.bf16.msra.mxu1 %v2271_v17  ;;  %1497 = vmatprep.subr.bf16.mxu0 %v2273_v20 }
  0xc5   : > { %1529 = vmatprep.subr.bf16.mxu1 %v2276_v25 }
  0xc7   : > { %1499 = vmatpush1.bf16.msra.mxu0 %v2283_v34 }
  0xc8   : > { %1531 = vmatpush1.bf16.msra.mxu1 %v2288_v35  ;;  %1501 = vmatprep.subr.bf16.mxu0 %v2290_v37 }
  0xc9   : > { %1533 = vmatprep.subr.bf16.mxu1 %v2293_v43 }
  0xcb   : > { %1503 = vmatpush1.bf16.msra.mxu0 %v2299_v50 }
  0xcc   : > { %1535 = vmatpush1.bf16.msra.mxu1 %v2303_v51  ;;  %1505 = vmatprep.subr.bf16.mxu0 %v2305_v53 }
  0xcd   : > { %1537 = vmatprep.subr.bf16.mxu1 %v2308_v58 }
  0xcf   : > { %1507 = vmatpush1.bf16.msra.mxu0 %v2311_v62 }
  0xd0   : > { %1539 = vmatpush1.bf16.msra.mxu1 %v2315_v63  ;;  %1541 = vmatprep.subr.bf16.mxu0 %v2209_v18 }
  0xd1   : > { %1573 = vmatprep.subr.bf16.mxu1 %v2211_v19  ;;  %v2371_v19 = vrot.slane %v320_v9, %v332_v12  ;;  %v772_v9 = vmul.f32 %v771_v61, %v596_v49 }
 0x185   : > { %v667_v14 = vpop.f32.mrb[0].mxu0 }
 0x186   : > { %v1628_v18 = vadd.f32 %v667_v14, %v2363_v11  ;;  %v738_v16 = vpop.f32.mrb[0].mxu1  ;;  %v669_v21 = vpop.f32.mrb[1].mxu0 }
 0x187   : > { %v1629_v24 = vadd.f32 %v669_v21, %v2365_v13  ;;  %v740_v26 = vpop.f32.mrb[1].mxu1  ;;  %v1634_v30 = vadd.f32 %v738_v16, %v2371_v19 }
 0x188   : > { %v747_v28 = vmul.f32 0.5, %v1628_v18  ;;  %v1635_v38 = vadd.f32 %v740_v26, %v2376_v33 }
 0x189   : > { %v751_v29 = vmul.f32 0.5, %v1629_v24  ;;  %v775_v24 = vmul.f32 %v771_v61, %v2319_v0 }
 0x18a   : > { %1740 = vtanh.f32 %v747_v28  ;;  %v756_v39 = vmul.f32 0.5, %v1635_v38 }
 0x18b   : > { %1742 = vtanh.f32 %v751_v29 }
 0x18c   : > { %1744 = vtanh.f32 %v1634_v30 }
 0x18d   : > { %1746 = vtanh.f32 %v756_v39 }
 0x194   : > { %v1741_v42 = vpop.eup %1740 }
 0x195   : > { %v1743_v44 = vpop.eup %1742  ;;  %v749_v46 = vmul.f32 0.5, %v1741_v42 }
 0x196   : > { %v753_v47 = vmul.f32 0.5, %v1743_v44  ;;  %v1745_v56 = vpop.eup %1744 }
 0x197   : > { %v750_v48 = vadd.f32 0.5, %v749_v46  ;;  %v1747_v12 = vpop.eup %1746 }
 0x198   : > { %v754_v57 = vadd.f32 0.5, %v753_v47  ;;  %v758_v18 = vmul.f32 0.5, %v1747_v12 }
 0x199   : > { %v761_v60 = vmul.f32 %v1745_v56, %v750_v48 }
 0x19a   : > { %v760_v4 = vmul.f32 %v754_v57, %v596_v49  ;;  %v759_v16 = vadd.f32 0.5, %v758_v18 }
 0x19c   : > { %v762_v6 = vadd.f32 %v761_v60, %v760_v4 }
 0x19e   : > { %1748 = vtanh.f32 %v762_v6  ;;  %v769_v10 = vmul.f32 %v768_v5, %v762_v6 }
 0x1a0   : > { %v2379_v14 = vadd.f32 %v772_v9, %v769_v10 }
 0x1a8   : > { %v1749_v21 = vpop.eup %1748 }
 0x1a9   : > { %v764_v22 = vmul.f32 %v1749_v21, %v759_v16 }
 0x1ab   : > { %v774_v26 = vmul.f32 %v768_v5, %v764_v22 }
 0x1ad   : > { %v2382_v28 = vadd.f32 %v775_v24, %v774_v26 }
 0x1af   : > { %847 = vmatmul.mubr.f32.vlgmr.msra.gmra.mrb[2].mxu0 %v2382_v28  ;;  %918 = vmatmul.mubr.f32.vlgmr.msra.gmra.mrb[2].mxu1 %v2382_v28 }
 0x1b0   : > { %1543 = vmatpush1.bf16.msra.mxu0 %v2214_v23  ;;  %1575 = vmatpush1.bf16.msra.mxu1 %v2218_v27 }
 0x1b1   : > { %1545 = vmatprep.subr.bf16.mxu0 %v2221_v31  ;;  %1577 = vmatprep.subr.bf16.mxu1 %v2223_v32 }
 0x1b2   : > { %1028 = vmatprep.mubr.f32.mxu0 %v1967_v8  ;;  %1099 = vmatprep.mubr.f32.mxu1 %v1967_v8 }
 0x1b4   : > { %1547 = vmatpush1.bf16.msra.mxu0 %v2227_v36  ;;  %1579 = vmatpush1.bf16.msra.mxu1 %v2231_v40 }
 0x1b5   : > { %1549 = vmatprep.subr.bf16.mxu0 %v2233_v41  ;;  %1581 = vmatprep.subr.bf16.mxu1 %v2236_v45 }
 0x1b8   : > { %1551 = vmatpush1.bf16.msra.mxu0 %v2241_v52  ;;  %1583 = vmatpush1.bf16.msra.mxu1 %v2245_v54 }
 0x1b9   : > { %1553 = vmatprep.subr.bf16.mxu0 %v2247_v55  ;;  %1585 = vmatprep.subr.bf16.mxu1 %v2250_v59 }
 0x1bc   : > { %1555 = vmatpush1.bf16.msra.mxu0 %v2253_v1  ;;  %1587 = vmatpush1.bf16.msra.mxu1 %v2257_v2 }
 0x1bd   : > { %1557 = vmatprep.subr.bf16.mxu0 %v2259_v3  ;;  %1589 = vmatprep.subr.bf16.mxu1 %v2262_v7 }
 0x1c0   : > { %1559 = vmatpush1.bf16.msra.mxu0 %v2266_v15  ;;  %1591 = vmatpush1.bf16.msra.mxu1 %v2271_v17 }
 0x1c1   : > { %1561 = vmatprep.subr.bf16.mxu0 %v2273_v20  ;;  %1593 = vmatprep.subr.bf16.mxu1 %v2276_v25  ;;  %v950_v25 = vstv %s949_s29 }
 0x1c4   : > { %1563 = vmatpush1.bf16.msra.mxu0 %v2283_v34  ;;  %1595 = vmatpush1.bf16.msra.mxu1 %v2288_v35  ;;  %v953_v34 = vstv %s952_s18 }
 0x1c5   : > { %1565 = vmatprep.subr.bf16.mxu0 %v2290_v37  ;;  %1597 = vmatprep.subr.bf16.mxu1 %v2293_v43  ;;  %v954_v43 = vmul.f32 %v953_v34, %v2379_v14  ;;  %v957_v29 = vmul.f32 %v953_v34, %v2382_v28  ;;  %v1157_v34 = vld [vmem:[#allocation11 + $0x50] sm:$0xff] (!%p1345_p8) }
 0x1c8   : > { %1567 = vmatpush1.bf16.msra.mxu0 %v2299_v50  ;;  %1599 = vmatpush1.bf16.msra.mxu1 %v2303_v51 }
 0x1c9   : > { %1569 = vmatprep.subr.bf16.mxu0 %v2305_v53  ;;  %1601 = vmatprep.subr.bf16.mxu1 %v2308_v58 }
 0x1cc   : > { %1571 = vmatpush1.bf16.msra.mxu0 %v2311_v62  ;;  %1603 = vmatpush1.bf16.msra.mxu1 %v2315_v63 }
 0x282   : > { %v848_v8 = vpop.f32.mrb[2].mxu0  ;;  %v919_v23 = vpop.f32.mrb[2].mxu1 }
 0x283   : > { %v1630_v27 = vadd.f32 %v848_v8, %v2363_v11  ;;  %v850_v31 = vpop.f32.mrb[3].mxu0  ;;  %v921_v32 = vpop.f32.mrb[3].mxu1  ;;  %v1636_v45 = vadd.f32 %v919_v23, %v2371_v19 }
 0x284   : > { %v1631_v36 = vadd.f32 %v850_v31, %v2365_v13  ;;  %v1637_v52 = vadd.f32 %v921_v32, %v2376_v33  ;;  %v1147_v32 = vld [vmem:[#allocation11] sm:$0xff] (!%p1345_p8) }
 0x285   : > { %v928_v40 = vmul.f32 0.5, %v1630_v27 }
 0x286   : > { %v932_v41 = vmul.f32 0.5, %v1631_v36  ;;  %v937_v54 = vmul.f32 0.5, %v1637_v52  ;;  %v1148_v36 = vld [vmem:[#allocation11 + $0x8] sm:$0xff] (!%p1345_p8)  ;;  %v1150_v52 = vld [vmem:[#allocation11 + $0x18] sm:$0xff] (!%p1345_p8) }
 0x287   : > { %1750 = vtanh.f32 %v928_v40  ;;  %v1149_v40 = vld [vmem:[#allocation11 + $0x10] sm:$0xff] (!%p1345_p8) }
 0x288   : > { %1752 = vtanh.f32 %v932_v41  ;;  %v1968_v41 = vmov (!%p1345_p8), 0.0|0.0  }
 0x289   : > { %1754 = vtanh.f32 %v1636_v45  ;;  %1604 = vmatprep.subr.bf16.mxu0 (!%p1345_p8), %v1968_v41  ;;  %v1605_v45 = vpack.c.bf16 (!%p1345_p8), %v1148_v36, %v1147_v32 }
 0x28a   : > { %1756 = vtanh.f32 %v937_v54  ;;  %v1970_v54 = vmov (!%p1345_p8), 0.0  }
 0x291   : > { %v1751_v55 = vpop.eup %1750 }
 0x292   : > { %v1753_v59 = vpop.eup %1752  ;;  %v930_v1 = vmul.f32 0.5, %v1751_v55  ;;  %v1608_v55 = vpack.c.bf16 (!%p1345_p8), %v1150_v52, %v1149_v40 }
 0x293   : > { %v934_v2 = vmul.f32 0.5, %v1753_v59  ;;  %v1755_v7 = vpop.eup %1754  ;;  %v1151_v59 = vld [vmem:[#allocation11 + $0x20] sm:$0xff] (!%p1345_p8) }
 0x294   : > { %v931_v3 = vadd.f32 0.5, %v930_v1  ;;  %v1757_v50 = vpop.eup %1756  ;;  %v1152_v1 = vld [vmem:[#allocation11 + $0x28] sm:$0xff] (!%p1345_p8) }
 0x295   : > { %v935_v15 = vadd.f32 0.5, %v934_v2  ;;  %v939_v53 = vmul.f32 0.5, %v1757_v50  ;;  %v1611_v2 = vpack.c.bf16 (!%p1345_p8), %v1152_v1, %v1151_v59  ;;  %v1160_v50 = vld [vmem:[#allocation11 + $0x68] sm:$0xff] (!%p1345_p8) }
 0x296   : > { %v942_v17 = vmul.f32 %v1755_v7, %v931_v3  ;;  %v1153_v3 = vld [vmem:[#allocation11 + $0x30] sm:$0xff] (!%p1345_p8)  ;;  %v1154_v7 = vld [vmem:[#allocation11 + $0x38] sm:$0xff] (!%p1345_p8) }
 0x297   : > { %v941_v20 = vmul.f32 %v935_v15, %v2379_v14  ;;  %v940_v58 = vadd.f32 0.5, %v939_v53  ;;  %v1132_v14 = vstv %s1131_s28  ;;  %v1614_v15 = vpack.c.bf16 (!%p1345_p8), %v1154_v7, %v1153_v3  ;;  %v1161_v53 = vld [vmem:[#allocation11 + $0x70] sm:$0xff] (!%p1345_p8) }
 0x299   : > { %v943_v35 = vadd.f32 %v942_v17, %v941_v20  ;;  %v1155_v17 = vld [vmem:[#allocation11 + $0x40] sm:$0xff] (!%p1345_p8)  ;;  %v1156_v20 = vld [vmem:[#allocation11 + $0x48] sm:$0xff] (!%p1345_p8) }
 0x29b   : > { %1758 = vtanh.f32 %v943_v35  ;;  %v951_v37 = vmul.f32 %v950_v25, %v943_v35  ;;  %v1158_v35 = vld [vmem:[#allocation11 + $0x58] sm:$0xff] (!%p1345_p8) }
 0x29d   : > { %v955_v51 = vadd.f32 %v954_v43, %v951_v37  ;;  %v1620_v37 = vpack.c.bf16 (!%p1345_p8), %v1158_v35, %v1157_v34  ;;  %v1159_v43 = vld [vmem:[#allocation11 + $0x60] sm:$0xff] (!%p1345_p8) }
 0x2a5   : > { %v1759_v62 = vpop.eup %1758 }
 0x2a6   : > { %v945_v63 = vmul.f32 %v1759_v62, %v940_v58  ;;  %v1162_v58 = vld [vmem:[#allocation11 + $0x78] sm:$0xff] (!%p1345_p8) }
 0x2a7   : > { %v1626_v62 = vpack.c.bf16 (!%p1345_p8), %v1162_v58, %v1161_v53 }
 0x2a8   : > { %v956_v0 = vmul.f32 %v950_v25, %v945_v63  ;;  %v1617_v25 = vpack.c.bf16 (!%p1345_p8), %v1156_v20, %v1155_v17  ;;  %v1346_v63 = vld [vmem:[%s2476_s5] ss:$0 sm:$0xff] (!%p1345_p8) }
 0x2aa   : > { %v958_v30 = vadd.f32 %v957_v29, %v956_v0 }
 0x2ac   : > { %1029 = vmatmul.mubr.f32.vlgmr.msra.gmra.mrb[4].mxu0 %v958_v30  ;;  %1100 = vmatmul.mubr.f32.vlgmr.msra.gmra.mrb[4].mxu1 %v958_v30 }
 0x2ad   : > { %1401 = vmatprep.mubr.msk.f32.mxu0 (!%p1345_p8), %vm1969_vm1, %v1970_v54  ;;  %1606 = vmatpush3.bf16.msra.mxu0 (!%p1345_p8), %v1605_v45 }
 0x2ae   : > { %1607 = vmatprep.subr.bf16.mxu0 (!%p1345_p8), %v1968_v41 }
 0x2b1   : > { %1609 = vmatpush3.bf16.msra.mxu0 (!%p1345_p8), %v1608_v55 }
 0x2b2   : > { %1610 = vmatprep.subr.bf16.mxu0 (!%p1345_p8), %v1968_v41 }
 0x2b5   : > { %1612 = vmatpush3.bf16.msra.mxu0 (!%p1345_p8), %v1611_v2 }
 0x2b6   : > { %1613 = vmatprep.subr.bf16.mxu0 (!%p1345_p8), %v1968_v41 }
 0x2b9   : > { %1615 = vmatpush3.bf16.msra.mxu0 (!%p1345_p8), %v1614_v15 }
 0x2ba   : > { %1616 = vmatprep.subr.bf16.mxu0 (!%p1345_p8), %v1968_v41 }
 0x2bd   : > { %1618 = vmatpush3.bf16.msra.mxu0 (!%p1345_p8), %v1617_v25 }
 0x2be   : > { %1619 = vmatprep.subr.bf16.mxu0 (!%p1345_p8), %v1968_v41 }
 0x2c1   : > { %1621 = vmatpush3.bf16.msra.mxu0 (!%p1345_p8), %v1620_v37 }
 0x2c2   : > { %1622 = vmatprep.subr.bf16.mxu0 (!%p1345_p8), %v1968_v41 }
 0x37f   : > { %v1030_v38 = vpop.f32.mrb[4].mxu0  ;;  %v1101_v39 = vpop.f32.mrb[4].mxu1 }
 0x380   : > { %v1632_v42 = vadd.f32 %v1030_v38, %v2363_v11  ;;  %v1032_v44 = vpop.f32.mrb[5].mxu0  ;;  %v1103_v46 = vpop.f32.mrb[5].mxu1  ;;  %v1638_v56 = vadd.f32 %v1101_v39, %v2371_v19  ;;  %v1135_v19 = vstv %s1134_s10 }
 0x381   : > { %v1633_v47 = vadd.f32 %v1032_v44, %v2365_v13  ;;  %v1639_v57 = vadd.f32 %v1103_v46, %v2376_v33  ;;  %v1136_v16 = vmul.f32 %v1135_v19, %v955_v51  ;;  %v1139_v27 = vmul.f32 %v1135_v19, %v958_v30 }
 0x382   : > { %v1110_v48 = vmul.f32 0.5, %v1632_v42 }
 0x383   : > { %v1114_v49 = vmul.f32 0.5, %v1633_v47  ;;  %v1119_v60 = vmul.f32 0.5, %v1639_v57 }
 0x384   : > { %1760 = vtanh.f32 %v1110_v48 }
 0x385   : > { %1762 = vtanh.f32 %v1114_v49 }
 0x386   : > { %1764 = vtanh.f32 %v1638_v56 }
 0x387   : > { %1766 = vtanh.f32 %v1119_v60 }
 0x38e   : > { %v1761_v61 = vpop.eup %1760 }
 0x38f   : > { %v1763_v11 = vpop.eup %1762  ;;  %v1112_v4 = vmul.f32 0.5, %v1761_v61 }
 0x390   : > { %v1116_v5 = vmul.f32 0.5, %v1763_v11  ;;  %v1765_v6 = vpop.eup %1764 }
 0x391   : > { %v1113_v13 = vadd.f32 0.5, %v1112_v4  ;;  %v1767_v21 = vpop.eup %1766 }
 0x392   : > { %v1117_v9 = vadd.f32 0.5, %v1116_v5  ;;  %v1121_v24 = vmul.f32 0.5, %v1767_v21 }
 0x393   : > { %v1124_v10 = vmul.f32 %v1765_v6, %v1113_v13 }
 0x394   : > { %v1123_v12 = vmul.f32 %v1117_v9, %v955_v51  ;;  %v1122_v26 = vadd.f32 0.5, %v1121_v24  ;;  %v1623_v51 = vpack.c.bf16 (!%p1345_p8), %v1160_v50, %v1159_v43 }
 0x396   : > { %v1125_v18 = vadd.f32 %v1124_v10, %v1123_v12  ;;  %1624 = vmatpush3.bf16.msra.mxu0 (!%p1345_p8), %v1623_v51 }
 0x397   : > { %1625 = vmatprep.subr.bf16.mxu0 (!%p1345_p8), %v1968_v41 }
 0x398   : > { %1768 = vtanh.f32 %v1125_v18  ;;  %v1133_v33 = vmul.f32 %v1132_v14, %v1125_v18 }
 0x39a   : > { %v1137_v22 = vadd.f32 %v1136_v16, %v1133_v33  ;;  %1627 = vmatpush3.bf16.msra.mxu0 (!%p1345_p8), %v1626_v62 }
 0x39c   : > { %1142 = vst [vmem:[#allocation3] sm:$0xff] %v1137_v22 }
 0x3a2   : > { %v1769_v28 = vpop.eup %1768 }
 0x3a3   : > { %v1127_v8 = vmul.f32 %v1769_v28, %v1122_v26  ;;  %1146 = sbr.rel (%p1345_p8) target bundleno = 1152 (0x480), region = 68 }
 0x3a5   : > { %v1138_v23 = vmul.f32 %v1132_v14, %v1127_v8 }
 0x3a7   : > { %v1140_v31 = vadd.f32 %v1139_v27, %v1138_v23 }
 0x3a9   : > { %1141 = vst [vmem:[#allocation2] sm:$0xff] %v1140_v31  ;;  %1402 = vmatmul.mubr.f32.vlgmr.msra.gmra.mrb[0].mxu0 (!%p1345_p8), %v1140_v31 }
 0x47c   : > { %v1236_v0 = vpop.f32.mrb[0].mxu0 }
 0x47d   : > { %v1237_v29 = vadd.f32 %v1346_v63, %v1236_v0  ;;  %v1403_v30 = vpop.f32.mrb[1].mxu0 }
 0x47f   : > { %1240 = vst [vmem:[#allocation13] sm:$0xff] %v1237_v29 }
 0x480 PF: > { %p1693_p3 = scmp.eq.s32.totalorder %s2026_s25, 2  ;;  %s1971_s15 = smov [#allocation13]  }
 0x481   : > { %s1248_s20 = sshll.u32 %s1971_s15, 4  ;;  %s1249_s20 = int_to_ptr.vmem [resolvable:$true] %s1248_s20 }
 0x482   : > { %s1884_s21 = scalar_lea.vmem %s1249_s20, 128  ;;  %p1891_p7 = scmp.lt.s32.totalorder %s1249_s20, %s1249_s20 }
 0x483   : > { %p1885_p9 = scmp.ne.s32.totalorder %s1249_s20, %s1884_s21  ;;  %p1892_p1 = scmp.lt.s32.totalorder %s1884_s21, %s1884_s21 }
 0x485   : > { %p1886_p11 = pnand %p1885_p9, %p1693_p3  ;;  %p1893_p0 = por %p1892_p1, %p1891_p7 }
 0x487   : > { %p1887_p2 = pneg %p1886_p11 }
 0x489   : > { %p1894_p4 = pnand %p1893_p0, %p1887_p2 }
 0x48b   : > { %1897 = shalt.err (!%p1894_p4)
}
 0x48c   : > { %s1898_s8 = scalar_lea.hbm %s2477_s6, 128 }
 0x48d   : > { %p1899_p5 = scmp.ne.s32.totalorder %s2477_s6, %s1898_s8  ;;  %p1904_p12 = scmp.lt.u32.totalorder %s1898_s8, %s2477_s6 }
 0x48f   : > { %p1900_p6 = pnand %p1899_p5, %p1693_p3 }
 0x491   : > { %p1901_p10 = pneg %p1900_p6 }
 0x493   : > { %p1906_p13 = pnand %p1904_p12, %p1901_p10 }
 0x495   : > { %1909 = shalt.err (!%p1906_p13)
}
 0x496   : > { %1669 = dma.vmem_to_hbm [thread:$0]  (%p1693_p3), %s1249_s20, 128, %s2477_s6, [#allocation7]  }
 0x497   : > { %1939 = dma.done.wait (%p1693_p3), [#allocation7], 128  }
 0x498   : > { %1941 = vsyncadd (%p1693_p3), [#allocation7], 4294967168 }
 0x499 PF: > { %p19_p8 = scmp.ge.s32.totalorder %s2132_s17, 5   ;;  %s2493_s21 = smov %s1948_s22 }
 0x49a   : > { %s2494_s22 = smov %s1952_s23  ;;  %s2495_s23 = smov %s2142_s19 }
 0x49b   : > { %s2496_s24 = smov %s2132_s17  ;;  %21 = sbr.rel (!%p19_p8) target bundleno = 6 (0x6), region = 103 }
 0x4a2   :  { %1261 = vsyncpa [#allocation6], 1 }
 0x4a3   :  { %1263 = vsyncpa [#allocation6 + $0x1], 1 }
 0x4a4   :  { %1264 = vsyncpa [#allocation9], 1 }
 0x4a5   :  { %1265 = vsyncpa [#allocation12], 1 }
 0x4a6   :  { %1266 = vsyncpa [#allocation7], 1 }
 0x4a7   :  { %1268 = vsyncpa [#allocation7 + $0x1], 1 }

</bundles_post_ra>
